<compile_context>
chip_gen: v5e
topology: v5e:2x2
jax: 0.10.0
libtpu: 0.0.40
codegen_flags: <defaults>
</compile_context>

<pallas_src>
import jax
import jax.numpy as jnp
from jax.experimental import pallas as pl
from jax.experimental.pallas import tpu as pltpu

EPS = 1e-6
_VMEM_TILE_BUDGET = 40 * 1024 * 1024      # keep tile footprint under ~40 MiB (v7x-safe)
_VMEM_LIMIT_CAP = 48 * 1024 * 1024        # scoped VMEM limit cap (v7x has 64 MiB physical)


def _round_up(x, m):
    return (x + m - 1) // m * m


def _vmem_footprint(tm, tn, D, x_bytes, out_bytes):
    """Resident VMEM bytes for one grid step (double-buffered pipelines + scratch)."""
    buf = 2                                   # BlockSpec double buffering
    f = buf * tm * D * x_bytes                # x row tile (full feature dim, LN + residual)
    f += buf * D * tn * 2                     # bf16 W^T column block
    f += buf * tn * 4                         # bias column block (f32)
    f += buf * 2 * D * 4                      # a_2 / b_2 (f32)
    f += buf * tm * tn * out_bytes            # output tile
    f += tm * D * 2                           # normed scratch (bf16, single buffer)
    return f


def _pick_tiles(rows, D, x_bytes, out_bytes, tm, tn):
    rows8 = _round_up(rows, 8)
    if tn is None:
        tn = D
        # Keep the full (D, D) bf16 weight resident unless its double-buffer
        # alone would blow past half the tile budget; then column-tile it.
        if 2 * D * D * 2 > _VMEM_TILE_BUDGET // 2:
            for cand in (2048, 1024, 512, 256, 128):
                if D % cand == 0:
                    tn = cand
                    break
    assert D % tn == 0, "tn must divide the feature dimension"
    # Row tile: large enough to amortize the ~0.35us per-step overhead, clamped
    # so tiny inputs stay a one-step grid, then shrunk to fit the VMEM budget.
    tm = max(8, min(tm, rows8))
    while _vmem_footprint(tm, tn, D, x_bytes, out_bytes) > _VMEM_TILE_BUDGET and tm > 64:
        tm = max(64, tm // 2)
    # TODO(synk): for D large enough that a single (D, tn) weight column block
    #             still overflows the budget at tm=64, add a K-tile grid axis
    #             with an f32 accumulator scratch gated by pl.when.
    return tm, tn


def sublayer_connection_kernel(x_ref, a2_ref, b2_ref, wT_ref, bias_ref,
                               o_ref, normed_ref):
    # x_ref:      (tm, D)   input rows, full feature dim (LN stats + residual)
    # a2/b2:      (1, D)    LayerNorm scale / shift (f32)
    # wT_ref:     (D, tn)   sublayer Linear weight column block, (in, out), bf16
    # bias_ref:   (1, tn)   sublayer Linear bias column block (f32)
    # o_ref:      (tm, tn)  output tile
    # normed_ref: (tm, D)   bf16 VMEM scratch holding LayerNorm(x) for this row tile
    j = pl.program_id(1)
    tn = o_ref.shape[-1]
    D = x_ref.shape[-1]

    # --- LayerNorm: computed once per row tile (j == 0), reused for all j ---
    @pl.when(j == 0)
    def _():
        x = x_ref[...].astype(jnp.float32)
        mean = jnp.mean(x, axis=-1, keepdims=True)
        centered = x - mean
        var_unbiased = jnp.sum(centered * centered, axis=-1, keepdims=True) / (D - 1)
        # Approximate reciprocal runs on the EUP (otherwise-idle slot) and
        # removes a full-tile f32 divide from the VALU path.
        inv_std = pl.reciprocal(jnp.sqrt(var_unbiased) + EPS, approx=True)
        normed = centered * (inv_std * a2_ref[...].astype(jnp.float32)) \
            + b2_ref[...].astype(jnp.float32)
        normed_ref[...] = normed.astype(normed_ref.dtype)   # single bf16 cast for the MXU

    # --- sublayer: Linear(D, D) column block, bf16 MXU, f32 accumulation ---
    h = jnp.dot(normed_ref[...], wT_ref[...],
                preferred_element_type=jnp.float32)
    h = h + bias_ref[...].astype(jnp.float32)

    # --- dropout (inference mode: identity) + residual ---
    # Residual columns come from the SAME x tile (no duplicate HBM stream).
    if tn == D:
        xr = x_ref[...]
    else:
        col = pl.multiple_of(j * tn, tn)          # tn is a multiple of 128 here
        xr = x_ref[:, pl.ds(col, tn)]
    o_ref[...] = (xr.astype(jnp.float32) + h).astype(o_ref.dtype)


def sublayer_connection(x, a2, b2, w_t, bias, *, tm=512, tn=None):
    """Fused pre-norm residual block: out = x + Linear(LayerNorm(x)).

    x:     [B, S, D]  (f32 or bf16; stats/accumulation are always f32)
    a2,b2: [D]        LayerNorm affine parameters
    w_t:   [D, D]     sublayer Linear weight ALREADY transposed to (in, out);
                      cast to bf16 for the MXU (half-width weight streaming)
    bias:  [D]
    """
    B, S, D = x.shape
    rows = B * S
    x_bytes = jnp.dtype(x.dtype).itemsize
    out_bytes = x_bytes

    tm, tn = _pick_tiles(rows, D, x_bytes, out_bytes, tm, tn)
    rows_p = _round_up(rows, tm)

    x2 = x.reshape(rows, D)
    if rows_p != rows:
        x2 = jnp.pad(x2, ((0, rows_p - rows), (0, 0)))  # tail rows, sliced off below

    a2_2 = a2.reshape(1, D).astype(jnp.float32)
    b2_2 = b2.reshape(1, D).astype(jnp.float32)
    bias_2 = bias.reshape(1, D).astype(jnp.float32)
    w_t_bf16 = w_t if w_t.dtype == jnp.bfloat16 else w_t.astype(jnp.bfloat16)

    grid = (rows_p // tm, D // tn)

    footprint = _vmem_footprint(tm, tn, D, x_bytes, out_bytes)
    vmem_limit = int(min(_VMEM_LIMIT_CAP,
                         max(2 * footprint + 2 * 1024 * 1024, 16 * 1024 * 1024)))

    cost = pl.CostEstimate(
        flops=2 * rows * D * D,
        transcendentals=rows,
        bytes_accessed=(rows_p * D * x_bytes          # x read (once)
                        + D * D * 2                   # bf16 weight
                        + 3 * D * 4                   # a2, b2, bias
                        + rows_p * D * out_bytes),    # output write
    )

    out = pl.pallas_call(
        sublayer_connection_kernel,
        out_shape=jax.ShapeDtypeStruct((rows_p, D), x.dtype),
        grid_spec=pltpu.PrefetchScalarGridSpec(
            num_scalar_prefetch=0,
            grid=grid,
            in_specs=[
                pl.BlockSpec((tm, D), lambda i, j: (i, 0)),    # x rows (LN + residual)
                pl.BlockSpec((1, D), lambda i, j: (0, 0)),     # a_2
                pl.BlockSpec((1, D), lambda i, j: (0, 0)),     # b_2
                pl.BlockSpec((D, tn), lambda i, j: (0, j)),    # W^T column block (bf16)
                pl.BlockSpec((1, tn), lambda i, j: (0, j)),    # bias column block
            ],
            out_specs=pl.BlockSpec((tm, tn), lambda i, j: (i, j)),
            scratch_shapes=[pltpu.VMEM((tm, D), jnp.bfloat16)],  # normed(x) per row tile
        ),
        compiler_params=pltpu.CompilerParams(
            # Row axis is independent ("parallel" -> v7x megacore sharding);
            # column axis reuses the LN scratch so it must stay sequential.
            dimension_semantics=("parallel", "arbitrary"),
            vmem_limit_bytes=vmem_limit,
        ),
        cost_estimate=cost,
    )(x2, a2_2, b2_2, w_t_bf16, bias_2)

    if rows_p != rows:
        out = out[:rows]
    return out.reshape(B, S, D)


def reference(x, a2, b2, w, bias):
    """Pure-JAX reference mirroring the PyTorch forward (eval-mode dropout)."""
    x = x.astype(jnp.float32)
    mean = jnp.mean(x, axis=-1, keepdims=True)
    D = x.shape[-1]
    std = jnp.sqrt(jnp.sum((x - mean) ** 2, axis=-1, keepdims=True) / (D - 1))
    normed = a2 * (x - mean) / (std + EPS) + b2
    h = normed @ w.T + bias
    return x + h


if __name__ == "__main__":
    key = jax.random.PRNGKey(0)
    B, S, D = 2, 8, 128  # batch=2, seq=8, hidden=128

    kx, kw, kb, kx2 = jax.random.split(key, 4)
    x = jax.random.normal(kx, (B, S, D), dtype=jnp.float32)

    # LayerNorm params per __init__: ones / zeros
    a2 = jnp.ones((D,), dtype=jnp.float32)
    b2 = jnp.zeros((D,), dtype=jnp.float32)

    # Deterministic synthetic sublayer (Linear(D, D)) parameters.
    w = jax.random.normal(kw, (D, D), dtype=jnp.float32) * 0.02       # (out, in)
    bias = jax.random.normal(kb, (D,), dtype=jnp.float32) * 0.02

    # Hoist the weight transpose out of the hot path (done once, not per call).
    w_t = jnp.asarray(w.T)                                            # (in, out)

    fn = jax.jit(sublayer_connection)

    # Tolerance covers the bf16 MXU operands + EUP approximate reciprocal.
    out = jax.block_until_ready(fn(x, a2, b2, w_t, bias))
    ref = reference(x, a2, b2, w, bias)
    assert out.shape == (B, S, D)
    assert jnp.allclose(out, ref, atol=5e-3, rtol=5e-3), "mismatch vs reference"

    # Second check: row count not divisible by the tile -> exercises the
    # zero-pad + slice tail path.
    x_tail = jax.random.normal(kx2, (3, 5, D), dtype=jnp.float32)
    out_tail = jax.block_until_ready(fn(x_tail, a2, b2, w_t, bias))
    ref_tail = reference(x_tail, a2, b2, w, bias)
    assert out_tail.shape == (3, 5, D)
    assert jnp.allclose(out_tail, ref_tail, atol=5e-3, rtol=5e-3), \
        "tail-padded case mismatch vs reference"

    print("KERNEL_OK")
</pallas_src>

<mosaic_0001>
module attributes {stable_mosaic.version = 11 : i64} {
  func.func @sublayer_connection_kernel(%arg0: i32, %arg1: i32, %arg2: memref<16x128xf32, #tpu.memory_space<vmem>>, %arg3: memref<1x128xf32, #tpu.memory_space<vmem>>, %arg4: memref<1x128xf32, #tpu.memory_space<vmem>>, %arg5: memref<128x128xbf16, #tpu.memory_space<vmem>>, %arg6: memref<1x128xf32, #tpu.memory_space<vmem>>, %arg7: memref<16x128xf32, #tpu.memory_space<vmem>>, %arg8: memref<16x128xbf16, #tpu.memory_space<vmem>>) attributes {dimension_semantics = [#tpu.dimension_semantics<parallel>, #tpu.dimension_semantics<arbitrary>], iteration_bounds = array<i64: 1, 1>, scalar_prefetch = 0 : i64, scratch_operands = 1 : i64, tpu.core_type = #tpu.core_type<tc>, window_params = [{transform_indices = @transform_0, window_bounds = array<i64: 16, 128>}, {pipeline_mode = #tpu.pipeline_mode<synchronous>, transform_indices = @transform_1, window_bounds = array<i64: 1, 128>}, {pipeline_mode = #tpu.pipeline_mode<synchronous>, transform_indices = @transform_2, window_bounds = array<i64: 1, 128>}, {transform_indices = @transform_3, window_bounds = array<i64: 128, 128>}, {transform_indices = @transform_4, window_bounds = array<i64: 1, 128>}, {transform_indices = @transform_5, window_bounds = array<i64: 16, 128>}]} {
    %c0_i32 = arith.constant 0 : i32
    %0 = arith.cmpi eq, %arg1, %c0_i32 : i32
    %1 = arith.extui %0 : i1 to i32
    %c0_i32_0 = arith.constant 0 : i32
    %2 = arith.cmpi ne, %1, %c0_i32_0 : i32
    scf.if %2 {
      %c0_10 = arith.constant 0 : index
      %c0_11 = arith.constant 0 : index
      %12 = vector.load %arg2[%c0_10, %c0_11] : memref<16x128xf32, #tpu.memory_space<vmem>>, vector<16x128xf32>
      %cst_12 = arith.constant dense<0.000000e+00> : vector<16xf32>
      %13 = vector.multi_reduction <add>, %12, %cst_12 [1] : vector<16x128xf32> to vector<16xf32>
      %14 = vector.shape_cast %13 : vector<16xf32> to vector<16x1xf32>
      %cst_13 = arith.constant 1.280000e+02 : f32
      %15 = vector.broadcast %cst_13 : f32 to vector<16x1xf32>
      %16 = arith.divf %14, %15 : vector<16x1xf32>
      %17 = vector.broadcast %16 : vector<16x1xf32> to vector<16x128xf32>
      %18 = arith.subf %12, %17 : vector<16x128xf32>
      %19 = arith.mulf %18, %18 : vector<16x128xf32>
      %cst_14 = arith.constant dense<0.000000e+00> : vector<16xf32>
      %20 = vector.multi_reduction <add>, %19, %cst_14 [1] : vector<16x128xf32> to vector<16xf32>
      %21 = vector.shape_cast %20 : vector<16xf32> to vector<16x1xf32>
      %cst_15 = arith.constant 1.270000e+02 : f32
      %22 = vector.broadcast %cst_15 : f32 to vector<16x1xf32>
      %23 = arith.divf %21, %22 : vector<16x1xf32>
      %24 = math.sqrt %23 : vector<16x1xf32>
      %cst_16 = arith.constant 9.99999997E-7 : f32
      %25 = vector.broadcast %cst_16 : f32 to vector<16x1xf32>
      %26 = arith.addf %24, %25 : vector<16x1xf32>
      %27 = tpu.reciprocal %26 {approx = true} : vector<16x1xf32> -> vector<16x1xf32>
      %c0_17 = arith.constant 0 : index
      %c0_18 = arith.constant 0 : index
      %28 = vector.load %arg3[%c0_17, %c0_18] : memref<1x128xf32, #tpu.memory_space<vmem>>, vector<1x128xf32>
      %29 = vector.broadcast %27 : vector<16x1xf32> to vector<16x128xf32>
      %30 = vector.broadcast %28 : vector<1x128xf32> to vector<16x128xf32>
      %31 = arith.mulf %29, %30 : vector<16x128xf32>
      %32 = arith.mulf %18, %31 : vector<16x128xf32>
      %c0_19 = arith.constant 0 : index
      %c0_20 = arith.constant 0 : index
      %33 = vector.load %arg4[%c0_19, %c0_20] : memref<1x128xf32, #tpu.memory_space<vmem>>, vector<1x128xf32>
      %34 = vector.broadcast %33 : vector<1x128xf32> to vector<16x128xf32>
      %35 = arith.addf %32, %34 : vector<16x128xf32>
      %36 = arith.truncf %35 : vector<16x128xf32> to vector<16x128xbf16>
      %c0_21 = arith.constant 0 : index
      %c0_22 = arith.constant 0 : index
      %37 = vector.load %arg8[%c0_21, %c0_22] : memref<16x128xbf16, #tpu.memory_space<vmem>>, vector<16x128xbf16>
      tpu.vector_store %arg8[%c0_21, %c0_22], %36 {strides = array<i32>} : memref<16x128xbf16, #tpu.memory_space<vmem>>, vector<16x128xbf16>,
    } else {
    }
    %c0 = arith.constant 0 : index
    %c0_1 = arith.constant 0 : index
    %3 = vector.load %arg8[%c0, %c0_1] : memref<16x128xbf16, #tpu.memory_space<vmem>>, vector<16x128xbf16>
    %c0_2 = arith.constant 0 : index
    %c0_3 = arith.constant 0 : index
    %4 = vector.load %arg5[%c0_2, %c0_3] : memref<128x128xbf16, #tpu.memory_space<vmem>>, vector<128x128xbf16>
    %cst = arith.constant dense<0.000000e+00> : vector<16x128xf32>
    %5 = tpu.matmul %3, %4, %cst {dimension_numbers = #tpu.dot_dimension_numbers<[1], [0], [0], [1], [0, 0, 1, 1], [], []>} : vector<16x128xbf16>, vector<128x128xbf16>, vector<16x128xf32> -> vector<16x128xf32>
    %c0_4 = arith.constant 0 : index
    %c0_5 = arith.constant 0 : index
    %6 = vector.load %arg6[%c0_4, %c0_5] : memref<1x128xf32, #tpu.memory_space<vmem>>, vector<1x128xf32>
    %7 = vector.broadcast %6 : vector<1x128xf32> to vector<16x128xf32>
    %8 = arith.addf %5, %7 : vector<16x128xf32>
    %c0_6 = arith.constant 0 : index
    %c0_7 = arith.constant 0 : index
    %9 = vector.load %arg2[%c0_6, %c0_7] : memref<16x128xf32, #tpu.memory_space<vmem>>, vector<16x128xf32>
    %10 = arith.addf %9, %8 : vector<16x128xf32>
    %c0_8 = arith.constant 0 : index
    %c0_9 = arith.constant 0 : index
    %11 = vector.load %arg7[%c0_8, %c0_9] : memref<16x128xf32, #tpu.memory_space<vmem>>, vector<16x128xf32>
    tpu.vector_store %arg7[%c0_8, %c0_9], %10 {strides = array<i32>} : memref<16x128xf32, #tpu.memory_space<vmem>>, vector<16x128xf32>,
    return
  }
  func.func @transform_0(%arg0: i32, %arg1: i32) -> (i32, i32) {
    %c0_i32 = arith.constant 0 : i32
    %c0_i32_0 = arith.constant 0 : i32
    return %arg0, %c0_i32 : i32, i32
  }
  func.func @transform_1(%arg0: i32, %arg1: i32) -> (i32, i32) {
    %c0_i32 = arith.constant 0 : i32
    %c0_i32_0 = arith.constant 0 : i32
    %c0_i32_1 = arith.constant 0 : i32
    return %c0_i32, %c0_i32_0 : i32, i32
  }
  func.func @transform_2(%arg0: i32, %arg1: i32) -> (i32, i32) {
    %c0_i32 = arith.constant 0 : i32
    %c0_i32_0 = arith.constant 0 : i32
    %c0_i32_1 = arith.constant 0 : i32
    return %c0_i32, %c0_i32_0 : i32, i32
  }
  func.func @transform_3(%arg0: i32, %arg1: i32) -> (i32, i32) {
    %c0_i32 = arith.constant 0 : i32
    %c0_i32_0 = arith.constant 0 : i32
    return %c0_i32, %arg1 : i32, i32
  }
  func.func @transform_4(%arg0: i32, %arg1: i32) -> (i32, i32) {
    %c0_i32 = arith.constant 0 : i32
    %c0_i32_0 = arith.constant 0 : i32
    return %c0_i32, %arg1 : i32, i32
  }
  func.func @transform_5(%arg0: i32, %arg1: i32) -> (i32, i32) {
    %c0_i32 = arith.constant 0 : i32
    return %arg0, %arg1 : i32, i32
  }
}

</mosaic_0001>

<bundles_post_ra>
// kernel: sublayer_connection.1
= control target key start
LH: loop header
LB: loop body
LE: loop exit
PB: predicated region body
PF: predicated region fallthrough
CT: control target
= control target key end

     0   :  { %s410_s0 = inlined_call_operand.vmem [shape: f32[16,128], index: 0, kind: input, shape index: {}]   ;;  %s411_s1 = inlined_call_operand.vmem [shape: f32[1,128], index: 1, kind: input, shape index: {}]   ;;  %s412_s2 = inlined_call_operand.vmem [shape: f32[1,128], index: 2, kind: input, shape index: {}]   ;;  %s413_s3 = inlined_call_operand.vmem [shape: bf16[128,128], index: 3, kind: input, shape index: {}]   ;;  %s414_s4 = inlined_call_operand.vmem [shape: f32[1,128], index: 4, kind: input, shape index: {}]   ;;  %s415_s5 = inlined_call_operand.hbm [shape: f32[16,128], index: 5, kind: output, shape index: {}]  }
   0x1   :  { %v351_v0 = vld [vmem:[%s410_s0] sm:$0xff] }
   0x2   :  { %27 = vadd.xlane.f32.xlu0 %v351_v0 }
   0x3   :  { %10 = vsyncpa [#allocation4], 0  ;;  %v357_v1 = vld [vmem:[%s410_s0 + $0x8] sm:$0xff]  ;;  %v313_v2 = vmov 128.0   ;;  %v314_v17 = vmov 127.0   ;;  %v261_v22 = vld [vmem:[%s413_s3 + $0x38] sm:$0xff] }
   0x4   :  { %275 = vrcp.f32 %v313_v2  ;;  %179 = vmatpush.bf16.msra.mxu0 %v261_v22  ;;  %v260_v24 = vld [vmem:[%s413_s3 + $0x30] sm:$0xff]  ;;  %v259_v28 = vld [vmem:[%s413_s3 + $0x28] sm:$0xff]  ;;  %v258_v29 = vld [vmem:[%s413_s3 + $0x20] sm:$0xff]  ;;  %s315_s16 = smov [#allocation3]   ;;  %s205_s19 = sshll.u32 %s415_s5, 4  ;;  %s206_s19 = int_to_ptr.hbm [resolvable:$true] %s205_s19 }
   0x5   :  { %277 = vrcp.f32 %v314_v17  ;;  %v257_v33 = vld [vmem:[%s413_s3 + $0x18] sm:$0xff]  ;;  %v256_v35 = vld [vmem:[%s413_s3 + $0x10] sm:$0xff]  ;;  %v255_v38 = vld [vmem:[%s413_s3 + $0x8] sm:$0xff]  ;;  %s203_s17 = sshll.u32 %s315_s16, 4  ;;  %s316_s20 = smov 128   ;;  %s204_s17 = int_to_ptr.vmem [resolvable:$true] %s203_s17 }
   0x6   :  { %v254_v43 = vld [vmem:[%s413_s3] sm:$0xff] }
   0x7   :  { %v272_v58 = vld [vmem:[%s411_s1] ss:$0 sm:$0xff] }
   0x8   :  { %180 = vmatpush.bf16.msra.mxu0 %v260_v24  ;;  %v273_v2 = vld [vmem:[%s412_s2] ss:$0 sm:$0xff] }
   0xa   :  { %29 = vadd.xlane.f32.xlu0 %v357_v1  ;;  %v276_v3 = vpop.eup %275 }
   0xb   :  { %v32_v4 = vmul.f32 128.0, %v276_v3  ;;  %vm36_vm0 = vweird.f32 %v276_v3  ;;  %v278_v18 = vpop.eup %277 }
   0xc   :  { %v49_v19 = vmul.f32 127.0, %v278_v18  ;;  %vm53_vm1 = vweird.f32 %v278_v18  ;;  %181 = vmatpush.bf16.msra.mxu0 %v259_v28 }
   0xd   :  { %v33_v5 = vsub.f32 1.0, %v32_v4 }
   0xe   :  { %v50_v20 = vsub.f32 1.0, %v49_v19 }
   0xf   :  { %v34_v6 = vmul.f32 %v276_v3, %v33_v5 }
  0x10   :  { %v51_v21 = vmul.f32 %v278_v18, %v50_v20  ;;  %182 = vmatpush.bf16.msra.mxu0 %v258_v29 }
  0x11   :  { %v35_v7 = vadd.f32 %v276_v3, %v34_v6 }
  0x12   :  { %v52_v23 = vadd.f32 %v278_v18, %v51_v21 }
  0x13   :  { %v37_v8 = vsel %vm36_vm0, %v276_v3, %v35_v7 }
  0x14   :  { %v54_v25 = vsel %vm53_vm1, %v278_v18, %v52_v23  ;;  %183 = vmatpush.bf16.msra.mxu0 %v257_v33 }
  0x18   :  { %184 = vmatpush.bf16.msra.mxu0 %v256_v35 }
  0x1c   :  { %185 = vmatpush.bf16.msra.mxu0 %v255_v38 }
  0x20   :  { %186 = vmatpush.bf16.msra.mxu0 %v254_v43 }
  0x75   :  { %v28_v9 = vpop.xlane.xlu0 %27 }
  0x76   :  { %v38_v10 = vmul.f32 %v37_v8, %v28_v9 }
  0x78   :  { %v361_v11 = vsub.f32 %v351_v0, %v38_v10 }
  0x7a   :  { %v42_v12 = vmul.f32 %v361_v11, %v361_v11 }
  0x7c   :  { %44 = vadd.xlane.f32.xlu1 %v42_v12 }
  0x7d   :  { %v30_v13 = vpop.xlane.xlu0 %29 }
  0x7e   :  { %v39_v14 = vmul.f32 %v37_v8, %v30_v13  ;;  %v274_v8 = vld [vmem:[%s414_s4] ss:$0 sm:$0xff]  ;;  %s317_s4 = smov 8  }
  0x80   :  { %v366_v15 = vsub.f32 %v357_v1, %v39_v14 }
  0x82   :  { %v43_v16 = vmul.f32 %v366_v15, %v366_v15 }
  0x84   :  { %46 = vadd.xlane.f32.xlu1 %v43_v16 }
  0xef   :  { %v45_v26 = vpop.xlane.xlu1 %44 }
  0xf0   :  { %v55_v27 = vmul.f32 %v54_v25, %v45_v26 }
  0xf2   :  { %279 = vrsqrt.f32 %v55_v27  ;;  %vm64_vm2 = vcmp.eq.f32.partialorder %v55_v27, inf  ;;  %v67_v46 = vand.u32 2147483648, %v55_v27  ;;  %vm66_vm3 = vcmp.eq.f32.partialorder %v55_v27, 0.0 }
  0xf7   :  { %v47_v30 = vpop.xlane.xlu1 %46 }
  0xf8   :  { %v280_v31 = vpop.eup %279  ;;  %v56_v32 = vmul.f32 %v54_v25, %v47_v30 }
  0xf9   :  { %v58_v34 = vmul.f32 %v280_v31, %v55_v27 }
  0xfa   :  { %281 = vrsqrt.f32 %v56_v32  ;;  %vm76_vm4 = vcmp.eq.f32.partialorder %v56_v32, inf  ;;  %v79_v54 = vand.u32 2147483648, %v56_v32  ;;  %vm78_vm5 = vcmp.eq.f32.partialorder %v56_v32, 0.0 }
  0xfb   :  { %v59_v36 = vmul.f32 %v280_v31, %v58_v34 }
  0xfd   :  { %v60_v37 = vmul.f32 0.5, %v59_v36 }
  0xff   :  { %v61_v39 = vsub.f32 1.5, %v60_v37 }
 0x100   :  { %v282_v40 = vpop.eup %281 }
 0x101   :  { %v62_v41 = vmul.f32 %v280_v31, %v61_v39  ;;  %v70_v42 = vmul.f32 %v282_v40, %v56_v32 }
 0x103   :  { %v63_v44 = vmul.f32 %v62_v41, %v55_v27  ;;  %v71_v45 = vmul.f32 %v282_v40, %v70_v42 }
 0x105   :  { %v65_v47 = vsel %vm64_vm2, %v55_v27, %v63_v44  ;;  %v72_v48 = vmul.f32 0.5, %v71_v45 }
 0x106   :  { %v68_v49 = vsel %vm66_vm3, %v67_v46, %v65_v47 }
 0x107   :  { %v81_v50 = vadd.f32 1e-06, %v68_v49  ;;  %v73_v51 = vsub.f32 1.5, %v72_v48 }
 0x109   :  { %v74_v52 = vmul.f32 %v282_v40, %v73_v51  ;;  %283 = vrcp.f32 %v81_v50 }
 0x10b   :  { %v75_v53 = vmul.f32 %v74_v52, %v56_v32 }
 0x10d   :  { %v77_v55 = vsel %vm76_vm4, %v56_v32, %v75_v53 }
 0x10e   :  { %v80_v56 = vsel %vm78_vm5, %v79_v54, %v77_v55 }
 0x10f   :  { %v82_v57 = vadd.f32 1e-06, %v80_v56  ;;  %v284_v59 = vpop.eup %283 }
 0x110   :  { %v89_v60 = vmul.f32 %v284_v59, %v272_v58 }
 0x111   :  { %285 = vrcp.f32 %v82_v57 }
 0x112   :  { %v91_v62 = vmul.f32 %v89_v60, %v361_v11 }
 0x114   :  { %v97_v4 = vadd.f32 %v273_v2, %v91_v62 }
 0x117   :  { %v286_v61 = vpop.eup %285 }
 0x118   :  { %v90_v63 = vmul.f32 %v286_v61, %v272_v58 }
 0x11a   :  { %v92_v3 = vmul.f32 %v90_v63, %v366_v15 }
 0x11c   :  { %v98_v5 = vadd.f32 %v273_v2, %v92_v3 }
 0x11e   :  { %v265_v6 = vpack.c.bf16 %v98_v5, %v97_v4 }
 0x120   :  { %266 = vst [vmem:[#allocation2] sm:$0xff] %v265_v6  }
 0x127   :  { %v253_v7 = vld [vmem:[#allocation2] sm:$0xff] }
 0x128   :  { %187 = vmatmul.bf16.vlgmr.msra.gmra.mxu0 %v253_v7 }
 0x1a5   :  { %v188_v9 = vpop.f32.mrf.mxu0 }
 0x1a6   :  { %v189_v10 = vadd.f32 %v274_v8, %v188_v9 }
 0x1a8   :  { %v195_v11 = vadd.f32 %v189_v10, %v351_v0 }
 0x1aa   :  { %197 = vst [vmem:[#allocation3] sm:$0xff] %v195_v11 }
 0x1ad   :  { %v190_v12 = vpop.f32.mrf.mxu0 }
 0x1ae   :  { %v191_v13 = vadd.f32 %v274_v8, %v190_v12 }
 0x1b0   :  { %v196_v14 = vadd.f32 %v191_v13, %v357_v1 }
 0x1b2   :  { %198 = vst [vmem:[#allocation3 + $0x8] sm:$0xff] %v196_v14 }
 0x1b3   :  { %211 = dma.vmem_to_hbm [thread:$0]  %s204_s17, 256, %s206_s19, [#allocation4], %s316_s20, %s316_s20, %s317_s4  }
 0x1b4   :  { %311 = dma.done.wait [#allocation4], 256  }
 0x1b5   :  { %312 = vsyncadd [#allocation4], 4294967040 }
 0x1b6   :  { %216 = vsyncpa [#allocation4], 1 }

</bundles_post_ra>
